<compile_context>
chip_gen: v7x
topology: tpu7x:2x2x1
jax: 0.10.0
libtpu: 0.0.40
codegen_flags: <defaults>
</compile_context>

<pallas_src>
import jax
import jax.numpy as jnp
from jax.experimental import pallas as pl
from jax.experimental.pallas import tpu as pltpu


def _round_up(a, b):
    return (a + b - 1) // b * b


def _siglip_mlp_kernel(x_ref, w1_ref, b1_ref, w2_ref, b2_ref, o_ref, acc_ref):
    k = pl.program_id(1)

    @pl.when(k == 0)
    def _init():
        acc_ref[...] = jnp.zeros_like(acc_ref)

    # fc1 partial: [tm, H] @ [H, ti] with f32 MXU accumulation.
    h = jnp.dot(x_ref[...], w1_ref[...], preferred_element_type=jnp.float32)
    h = h + b1_ref[...]                    # bias kept in f32
    # tanh-gelu in f32 (matches torch gelu(approximate='tanh'); keep f32 on v5e
    # where the VPU/EUP have no bf16 path).
    h = jax.nn.gelu(h, approximate=True)

    # fc2 partial accumulate: [tm, ti] @ [ti, H] -> (tm, H) f32 scratch.
    acc_ref[...] += jnp.dot(h.astype(w2_ref.dtype), w2_ref[...],
                            preferred_element_type=jnp.float32)

    @pl.when(k == pl.num_programs(1) - 1)
    def _finalize():
        o_ref[...] = (acc_ref[...] + b2_ref[...]).astype(o_ref.dtype)


def siglip_mlp(hidden_states, w1, b1, w2, b2, *, tm=256, ti=512,
               compute_dtype=None):
    """SiglipMLP forward.

    hidden_states: [B, S, H]; w1: [H, I]; b1: [I]; w2: [I, H]; b2: [H].
    Weights are stored pre-transposed relative to torch.nn.Linear ((in, out)).
    tm: row tile over tokens (multiple of 8; 256 aligns with v7x MXU).
    ti: tile over the intermediate dim (multiple of 128).
    compute_dtype: optionally cast x / w1 / w2 (e.g. jnp.bfloat16) for matmuls;
                   accumulation, biases and gelu stay in f32.
    """
    B, S, H = hidden_states.shape
    H_in, I = w1.shape
    assert H_in == H, "w1 must be (hidden, intermediate)"
    M = B * S
    out_dtype = hidden_states.dtype

    # Tile sizes: shrink to the (padded) problem size for small shapes,
    # otherwise keep 8-/128-aligned large tiles.
    tm_eff = min(tm, _round_up(M, 8))
    M_pad = _round_up(M, tm_eff)
    ti_eff = min(ti, _round_up(I, 128))
    I_pad = _round_up(I, ti_eff)

    x2d = hidden_states.reshape(M, H)
    if M_pad != M:
        x2d = jnp.pad(x2d, ((0, M_pad - M), (0, 0)))
    if I_pad != I:
        # Zero padding of the intermediate dim is exact: gelu(0 + 0) == 0 and
        # the corresponding w2 rows are zero, so padded columns contribute 0.
        w1 = jnp.pad(w1, ((0, 0), (0, I_pad - I)))
        b1 = jnp.pad(b1, ((0, I_pad - I),))
        w2 = jnp.pad(w2, ((0, I_pad - I), (0, 0)))

    if compute_dtype is not None:
        x2d = x2d.astype(compute_dtype)
        w1 = w1.astype(compute_dtype)
        w2 = w2.astype(compute_dtype)

    b1_2d = b1.reshape(1, I_pad).astype(jnp.float32)
    b2_2d = b2.reshape(1, H).astype(jnp.float32)

    grid_m = M_pad // tm_eff
    grid_k = I_pad // ti_eff

    op_bytes = jnp.dtype(x2d.dtype).itemsize
    flops = int(4 * M_pad * H * I_pad)              # two matmuls
    transcendentals = int(M_pad * I_pad)            # tanh inside gelu
    bytes_accessed = int(
        op_bytes * (2 * M_pad * H + grid_m * 2 * H * I_pad)  # x, out, weights
        + 4 * (I_pad + H))                                    # biases (f32)

    out2d = pl.pallas_call(
        _siglip_mlp_kernel,
        out_shape=jax.ShapeDtypeStruct((M_pad, H), out_dtype),
        grid_spec=pltpu.PrefetchScalarGridSpec(
            num_scalar_prefetch=0,
            grid=(grid_m, grid_k),
            in_specs=[
                pl.BlockSpec((tm_eff, H), lambda i, k: (i, 0)),   # x row tile
                pl.BlockSpec((H, ti_eff), lambda i, k: (0, k)),   # fc1 w tile
                pl.BlockSpec((1, ti_eff), lambda i, k: (0, k)),   # fc1 b tile
                pl.BlockSpec((ti_eff, H), lambda i, k: (k, 0)),   # fc2 w tile
                pl.BlockSpec((1, H), lambda i, k: (0, 0)),        # fc2 bias
            ],
            out_specs=pl.BlockSpec((tm_eff, H), lambda i, k: (i, 0)),
            scratch_shapes=[pltpu.VMEM((tm_eff, H), jnp.float32)],
        ),
        compiler_params=pltpu.CompilerParams(
            # M axis parallel (megacore / v7x dual-TC), I axis is the reduction.
            dimension_semantics=("parallel", "arbitrary"),
            # Above the 16/32 MiB scoped defaults but safely under v7x's 64 MiB.
            vmem_limit_bytes=48 * 1024 * 1024,
        ),
        cost_estimate=pl.CostEstimate(
            flops=flops,
            transcendentals=transcendentals,
            bytes_accessed=bytes_accessed,
        ),
    )(x2d, w1, b1_2d, w2, b2_2d)

    return out2d[:M].reshape(B, S, H)


if __name__ == "__main__":
    # Small SiglipVisionConfig-like dims for the correctness check.
    batch, seq = 2, 8
    hidden_size = 32
    intermediate_size = 128

    key = jax.random.PRNGKey(0)
    kx, kw1, kb1, kw2, kb2 = jax.random.split(key, 5)

    x = jax.random.normal(kx, (batch, seq, hidden_size), dtype=jnp.float32)
    # PyTorch Linear stores weight as (out, in); here kept pre-transposed.
    w1 = jax.random.normal(kw1, (hidden_size, intermediate_size),
                           dtype=jnp.float32) * 0.02
    b1 = jax.random.normal(kb1, (intermediate_size,), dtype=jnp.float32) * 0.02
    w2 = jax.random.normal(kw2, (intermediate_size, hidden_size),
                           dtype=jnp.float32) * 0.02
    b2 = jax.random.normal(kb2, (hidden_size,), dtype=jnp.float32) * 0.02

    out = siglip_mlp(x, w1, b1, w2, b2)
    out = jax.block_until_ready(out)

    # Pure-JAX reference check (f32 path).
    ref = jnp.dot(x, w1) + b1
    ref = jax.nn.gelu(ref, approximate=True)
    ref = jnp.dot(ref, w2) + b2
    assert jnp.allclose(out, ref, atol=1e-5, rtol=1e-5), "mismatch vs reference"

    print("KERNEL_OK")
</pallas_src>

<mosaic_0001>
module attributes {stable_mosaic.version = 11 : i64} {
  func.func @_siglip_mlp_kernel(%arg0: i32, %arg1: i32, %arg2: memref<16x32xf32, #tpu.memory_space<vmem>>, %arg3: memref<32x128xf32, #tpu.memory_space<vmem>>, %arg4: memref<1x128xf32, #tpu.memory_space<vmem>>, %arg5: memref<128x32xf32, #tpu.memory_space<vmem>>, %arg6: memref<1x32xf32, #tpu.memory_space<vmem>>, %arg7: memref<16x32xf32, #tpu.memory_space<vmem>>, %arg8: memref<16x32xf32, #tpu.memory_space<vmem>>) attributes {dimension_semantics = [#tpu.dimension_semantics<parallel>, #tpu.dimension_semantics<arbitrary>], iteration_bounds = array<i64: 1, 1>, scalar_prefetch = 0 : i64, scratch_operands = 1 : i64, tpu.core_type = #tpu.core_type<tc>, window_params = [{transform_indices = @transform_0, window_bounds = array<i64: 16, 32>}, {transform_indices = @transform_1, window_bounds = array<i64: 32, 128>}, {transform_indices = @transform_2, window_bounds = array<i64: 1, 128>}, {transform_indices = @transform_3, window_bounds = array<i64: 128, 32>}, {pipeline_mode = #tpu.pipeline_mode<synchronous>, transform_indices = @transform_4, window_bounds = array<i64: 1, 32>}, {transform_indices = @transform_5, window_bounds = array<i64: 16, 32>}]} {
    %c0_i32 = arith.constant 0 : i32
    %0 = arith.cmpi eq, %arg1, %c0_i32 : i32
    %1 = arith.extui %0 : i1 to i32
    %c0_i32_0 = arith.constant 0 : i32
    %2 = arith.cmpi ne, %1, %c0_i32_0 : i32
    scf.if %2 {
      %cst_19 = arith.constant 0.000000e+00 : f32
      %30 = vector.broadcast %cst_19 : f32 to vector<16x32xf32>
      %c0_20 = arith.constant 0 : index
      %c0_21 = arith.constant 0 : index
      %31 = vector.load %arg8[%c0_20, %c0_21] : memref<16x32xf32, #tpu.memory_space<vmem>>, vector<16x32xf32>
      tpu.vector_store %arg8[%c0_20, %c0_21], %30 {strides = array<i32>} : memref<16x32xf32, #tpu.memory_space<vmem>>, vector<16x32xf32>,
    } else {
    }
    %c0 = arith.constant 0 : index
    %c0_1 = arith.constant 0 : index
    %3 = vector.load %arg2[%c0, %c0_1] : memref<16x32xf32, #tpu.memory_space<vmem>>, vector<16x32xf32>
    %c0_2 = arith.constant 0 : index
    %c0_3 = arith.constant 0 : index
    %4 = vector.load %arg3[%c0_2, %c0_3] : memref<32x128xf32, #tpu.memory_space<vmem>>, vector<32x128xf32>
    %cst = arith.constant dense<0.000000e+00> : vector<16x128xf32>
    %5 = tpu.matmul %3, %4, %cst {dimension_numbers = #tpu.dot_dimension_numbers<[1], [0], [0], [1], [0, 0, 1, 1], [], []>} : vector<16x32xf32>, vector<32x128xf32>, vector<16x128xf32> -> vector<16x128xf32>
    %c0_4 = arith.constant 0 : index
    %c0_5 = arith.constant 0 : index
    %6 = vector.load %arg4[%c0_4, %c0_5] : memref<1x128xf32, #tpu.memory_space<vmem>>, vector<1x128xf32>
    %7 = vector.broadcast %6 : vector<1x128xf32> to vector<16x128xf32>
    %8 = arith.addf %5, %7 : vector<16x128xf32>
    %9 = arith.mulf %8, %8 : vector<16x128xf32>
    %10 = arith.mulf %8, %9 : vector<16x128xf32>
    %cst_6 = arith.constant 4.471500e-02 : f32
    %11 = vector.broadcast %cst_6 : f32 to vector<16x128xf32>
    %12 = arith.mulf %11, %10 : vector<16x128xf32>
    %13 = arith.addf %8, %12 : vector<16x128xf32>
    %cst_7 = arith.constant 0.797884583 : f32
    %14 = vector.broadcast %cst_7 : f32 to vector<16x128xf32>
    %15 = arith.mulf %14, %13 : vector<16x128xf32>
    %16 = math.tanh %15 : vector<16x128xf32>
    %cst_8 = arith.constant 1.000000e+00 : f32
    %17 = vector.broadcast %cst_8 : f32 to vector<16x128xf32>
    %18 = arith.addf %17, %16 : vector<16x128xf32>
    %cst_9 = arith.constant 5.000000e-01 : f32
    %19 = vector.broadcast %cst_9 : f32 to vector<16x128xf32>
    %20 = arith.mulf %19, %18 : vector<16x128xf32>
    %21 = arith.mulf %8, %20 : vector<16x128xf32>
    %c0_10 = arith.constant 0 : index
    %c0_11 = arith.constant 0 : index
    %22 = vector.load %arg8[%c0_10, %c0_11] : memref<16x32xf32, #tpu.memory_space<vmem>>, vector<16x32xf32>
    %c0_12 = arith.constant 0 : index
    %c0_13 = arith.constant 0 : index
    %23 = vector.load %arg5[%c0_12, %c0_13] : memref<128x32xf32, #tpu.memory_space<vmem>>, vector<128x32xf32>
    %cst_14 = arith.constant dense<0.000000e+00> : vector<16x32xf32>
    %24 = tpu.matmul %21, %23, %cst_14 {dimension_numbers = #tpu.dot_dimension_numbers<[1], [0], [0], [1], [0, 0, 1, 1], [], []>} : vector<16x128xf32>, vector<128x32xf32>, vector<16x32xf32> -> vector<16x32xf32>
    %25 = arith.addf %22, %24 : vector<16x32xf32>
    %c0_15 = arith.constant 0 : index
    %c0_16 = arith.constant 0 : index
    %26 = vector.load %arg8[%c0_15, %c0_16] : memref<16x32xf32, #tpu.memory_space<vmem>>, vector<16x32xf32>
    tpu.vector_store %arg8[%c0_15, %c0_16], %25 {strides = array<i32>} : memref<16x32xf32, #tpu.memory_space<vmem>>, vector<16x32xf32>,
    %c0_i32_17 = arith.constant 0 : i32
    %27 = arith.cmpi eq, %arg1, %c0_i32_17 : i32
    %28 = arith.extui %27 : i1 to i32
    %c0_i32_18 = arith.constant 0 : i32
    %29 = arith.cmpi ne, %28, %c0_i32_18 : i32
    scf.if %29 {
      %c0_19 = arith.constant 0 : index
      %c0_20 = arith.constant 0 : index
      %30 = vector.load %arg8[%c0_19, %c0_20] : memref<16x32xf32, #tpu.memory_space<vmem>>, vector<16x32xf32>
      %c0_21 = arith.constant 0 : index
      %c0_22 = arith.constant 0 : index
      %31 = vector.load %arg6[%c0_21, %c0_22] : memref<1x32xf32, #tpu.memory_space<vmem>>, vector<1x32xf32>
      %32 = vector.broadcast %31 : vector<1x32xf32> to vector<16x32xf32>
      %33 = arith.addf %30, %32 : vector<16x32xf32>
      %c0_23 = arith.constant 0 : index
      %c0_24 = arith.constant 0 : index
      %34 = vector.load %arg7[%c0_23, %c0_24] : memref<16x32xf32, #tpu.memory_space<vmem>>, vector<16x32xf32>
      tpu.vector_store %arg7[%c0_23, %c0_24], %33 {strides = array<i32>} : memref<16x32xf32, #tpu.memory_space<vmem>>, vector<16x32xf32>,
    } else {
    }
    return
  }
  func.func @transform_0(%arg0: i32, %arg1: i32) -> (i32, i32) {
    %c0_i32 = arith.constant 0 : i32
    %c0_i32_0 = arith.constant 0 : i32
    return %arg0, %c0_i32 : i32, i32
  }
  func.func @transform_1(%arg0: i32, %arg1: i32) -> (i32, i32) {
    %c0_i32 = arith.constant 0 : i32
    %c0_i32_0 = arith.constant 0 : i32
    return %c0_i32, %arg1 : i32, i32
  }
  func.func @transform_2(%arg0: i32, %arg1: i32) -> (i32, i32) {
    %c0_i32 = arith.constant 0 : i32
    %c0_i32_0 = arith.constant 0 : i32
    return %c0_i32, %arg1 : i32, i32
  }
  func.func @transform_3(%arg0: i32, %arg1: i32) -> (i32, i32) {
    %c0_i32 = arith.constant 0 : i32
    %c0_i32_0 = arith.constant 0 : i32
    return %arg1, %c0_i32 : i32, i32
  }
  func.func @transform_4(%arg0: i32, %arg1: i32) -> (i32, i32) {
    %c0_i32 = arith.constant 0 : i32
    %c0_i32_0 = arith.constant 0 : i32
    %c0_i32_1 = arith.constant 0 : i32
    return %c0_i32, %c0_i32_0 : i32, i32
  }
  func.func @transform_5(%arg0: i32, %arg1: i32) -> (i32, i32) {
    %c0_i32 = arith.constant 0 : i32
    %c0_i32_0 = arith.constant 0 : i32
    return %arg0, %c0_i32 : i32, i32
  }
}

</mosaic_0001>

<bundles_post_ra>
// kernel: tpu_custom_call.1
= control target key start
LH: loop header
LB: loop body
LE: loop exit
PB: predicated region body
PF: predicated region fallthrough
CT: control target
= control target key end

     0   :  { %vm25_vm0 = vcmask 261120   ;;  %s542_s0 = inlined_call_operand.vmem [shape: f32[16,32], index: 0, kind: input, shape index: {}]   ;;  %s543_s1 = inlined_call_operand.vmem [shape: f32[32,128], index: 1, kind: input, shape index: {}]   ;;  %s544_s2 = inlined_call_operand.vmem [shape: f32[1,128], index: 2, kind: input, shape index: {}]   ;;  %s545_s3 = inlined_call_operand.vmem [shape: f32[128,32], index: 3, kind: input, shape index: {}]   ;;  %s546_s4 = inlined_call_operand.vmem [shape: f32[1,32], index: 4, kind: input, shape index: {}]   ;;  %s547_s5 = inlined_call_operand.hbm [shape: f32[16,32], index: 5, kind: output, shape index: {}]  }
   0x1   :  { %v30_v0 = vld [vmem:[%s543_s1] sm:$0xff]  ;;  %v31_v1 = vld [vmem:[%s543_s1 + $0x8] sm:$0xff]  ;;  %v32_v2 = vld [vmem:[%s543_s1 + $0x10] sm:$0xff] }
   0x2   :  { %v344_v3 = vpack.c.bf16 %v31_v1, %v30_v0  ;;  %v33_v4 = vld [vmem:[%s543_s1 + $0x18] sm:$0xff]  ;;  %v28_v5 = vld [vmem:[%s542_s0] sm:$0xff] }
   0x3   :  { %v348_v6 = vpack.c.bf16 %v33_v4, %v32_v2  ;;  %306 = vmatprep.mubr.msk.f32.mxu0 %vm25_vm0, %v28_v5 }
   0x4   :  { %10 = vsyncpa [#allocation4], 0  ;;  %345 = vmatprep.subr.bf16.mxu0 %v344_v3  ;;  %v29_v7 = vld [vmem:[%s542_s0 + $0x8] sm:$0xff]  ;;  %v143_v8 = vld [vmem:[%s545_s3] sm:$0xff]  ;;  %v416_v32 = vmov 0.0   ;;  %s417_s11 = smov [#allocation3]  }
   0x5   :  { %347 = vmatpush3.bf16.msra.mxu0 %v344_v3  ;;  %v144_v9 = vld [vmem:[%s545_s3 + $0x8] sm:$0xff]  ;;  %v145_v11 = vld [vmem:[%s545_s3 + $0x10] sm:$0xff]  ;;  %v146_v12 = vld [vmem:[%s545_s3 + $0x18] sm:$0xff]  ;;  %27 = vst.msk [vmem:[#allocation2 + $0x8] sm:$0xff] %vm25_vm0, %v416_v32  ;;  %s259_s0 = sshll.u32 %s417_s11, 4  ;;  %s260_s0 = int_to_ptr.vmem [resolvable:$true] %s259_s0 }
   0x6   :  { %349 = vmatprep.subr.bf16.mxu0 %v348_v6  ;;  %v352_v10 = vpack.c.bf16 %v144_v9, %v143_v8  ;;  %v356_v13 = vpack.c.bf16 %v146_v12, %v145_v11  ;;  %v147_v14 = vld [vmem:[%s545_s3 + $0x20] sm:$0xff]  ;;  %v148_v15 = vld [vmem:[%s545_s3 + $0x28] sm:$0xff]  ;;  %v149_v17 = vld [vmem:[%s545_s3 + $0x30] sm:$0xff]  ;;  %26 = vst.msk [vmem:[#allocation2] sm:$0xff] %vm25_vm0, %v416_v32  ;;  %s392_s12 = scalar_lea.vmem %s260_s0, 256  ;;  %p397_p1 = scmp.lt.s32.totalorder %s260_s0, %s260_s0 }
   0x7   :  { %v360_v16 = vpack.c.bf16 %v148_v15, %v147_v14  ;;  %v150_v18 = vld [vmem:[%s545_s3 + $0x38] sm:$0xff]  ;;  %v151_v20 = vld [vmem:[%s545_s3 + $0x40] sm:$0xff]  ;;  %v152_v21 = vld [vmem:[%s545_s3 + $0x48] sm:$0xff]  ;;  %p393_p0 = scmp.ne.s32.totalorder %s260_s0, %s392_s12  ;;  %p398_p2 = scmp.lt.s32.totalorder %s392_s12, %s392_s12 }
   0x8   :  { %353 = vmatprep.subr.bf16.mxu1 %v352_v10  ;;  %v364_v19 = vpack.c.bf16 %v150_v18, %v149_v17  ;;  %v153_v22 = vld [vmem:[%s545_s3 + $0x50] sm:$0xff]  ;;  %v368_v23 = vpack.c.bf16 %v152_v21, %v151_v20  ;;  %v154_v24 = vld [vmem:[%s545_s3 + $0x58] sm:$0xff]  ;;  %v155_v26 = vld [vmem:[%s545_s3 + $0x60] sm:$0xff] }
   0x9   :  { %351 = vmatpush3.bf16.msra.mxu0 %v348_v6  ;;  %355 = vmatpush3.bf16.msra.mxu1 %v352_v10  ;;  %v372_v25 = vpack.c.bf16 %v154_v24, %v153_v22  ;;  %v156_v27 = vld [vmem:[%s545_s3 + $0x68] sm:$0xff]  ;;  %v157_v29 = vld [vmem:[%s545_s3 + $0x70] sm:$0xff]  ;;  %v158_v30 = vld [vmem:[%s545_s3 + $0x78] sm:$0xff]  ;;  %p399_p3 = por %p398_p2, %p397_p1 }
   0xa   :  { %357 = vmatprep.subr.bf16.mxu1 %v356_v13  ;;  %v376_v28 = vpack.c.bf16 %v156_v27, %v155_v26  ;;  %v380_v31 = vpack.c.bf16 %v158_v30, %v157_v29  ;;  %v270_v33 = vld [vmem:[%s544_s2] ss:$0 sm:$0xff] }
   0xb   :  { %v273_v62 = vld [vmem:[%s546_s4] ss:$0 sm:$0xff]  ;;  %p400_p4 = pnand %p399_p3, %p393_p0 }
   0xc   :  { %307 = vmatmul.mubr.msk.f32.vlgmr.msra.gmra.mrb[0].mxu0 %vm25_vm0, %v29_v7  ;;  %v142_v56 = vld [vmem:[#allocation2 + $0x8] sm:$0xff] }
   0xd   :  { %359 = vmatpush3.bf16.msra.mxu1 %v356_v13  ;;  %v141_v57 = vld [vmem:[#allocation2] sm:$0xff] }
   0xe   :  { %361 = vmatprep.subr.bf16.mxu1 %v360_v16 }
  0x11   :  { %363 = vmatpush3.bf16.msra.mxu1 %v360_v16 }
  0x12   :  { %365 = vmatprep.subr.bf16.mxu1 %v364_v19 }
  0x15   :  { %367 = vmatpush3.bf16.msra.mxu1 %v364_v19 }
  0x16   :  { %369 = vmatprep.subr.bf16.mxu1 %v368_v23 }
  0x19   :  { %371 = vmatpush3.bf16.msra.mxu1 %v368_v23 }
  0x1a   :  { %373 = vmatprep.subr.bf16.mxu1 %v372_v25 }
  0x1d   :  { %375 = vmatpush3.bf16.msra.mxu1 %v372_v25 }
  0x1e   :  { %377 = vmatprep.subr.bf16.mxu1 %v376_v28 }
  0x21   :  { %379 = vmatpush3.bf16.msra.mxu1 %v376_v28 }
  0x22   :  { %381 = vmatprep.subr.bf16.mxu1 %v380_v31 }
  0x25   :  { %383 = vmatpush3.bf16.msra.mxu1 %v380_v31 }
  0xdf   :  { %v308_v34 = vpop.f32.mrb[0].mxu0 }
  0xe0   :  { %v120_v35 = vadd.f32 %v308_v34, %v270_v33  ;;  %v114_v36 = vpop.f32.mrb[1].mxu0 }
  0xe1   :  { %v115_v37 = vadd.f32 %v270_v33, %v114_v36 }
  0xe2   :  { %v124_v38 = vmul.f32 %v120_v35, %v120_v35 }
  0xe3   :  { %v123_v39 = vmul.f32 %v115_v37, %v115_v37 }
  0xe4   :  { %v126_v40 = vmul.f32 %v124_v38, %v120_v35 }
  0xe5   :  { %v125_v41 = vmul.f32 %v123_v39, %v115_v37 }
  0xe6   :  { %v128_v42 = vmul.f32 0.044715, %v126_v40 }
  0xe7   :  { %v127_v43 = vmul.f32 0.044715, %v125_v41 }
  0xe8   :  { %v130_v44 = vadd.f32 %v128_v42, %v120_v35 }
  0xe9   :  { %v129_v45 = vadd.f32 %v127_v43, %v115_v37 }
  0xea   :  { %v132_v46 = vmul.f32 0.7978846, %v130_v44 }
  0xeb   :  { %v131_v47 = vmul.f32 0.7978846, %v129_v45 }
  0xec   :  { %388 = vtanh.f32 %v132_v46 }
  0xed   :  { %390 = vtanh.f32 %v131_v47 }
  0xf6   :  { %v389_v48 = vpop.eup %388 }
  0xf7   :  { %v391_v49 = vpop.eup %390  ;;  %v136_v50 = vadd.f32 1.0, %v389_v48 }
  0xf8   :  { %v135_v51 = vadd.f32 1.0, %v391_v49 }
  0xf9   :  { %v138_v52 = vmul.f32 0.5, %v136_v50 }
  0xfa   :  { %v137_v53 = vmul.f32 0.5, %v135_v51 }
  0xfb   :  { %v140_v55 = vmul.f32 %v138_v52, %v120_v35 }
  0xfc   :  { %v139_v54 = vmul.f32 %v137_v53, %v115_v37 }
  0xfe   :  { %341 = vmatprep.mubr.f32.mxu1 %v139_v54 }
  0xff   :  { %342 = vmatmul.mubr.f32.vlgmr.msra.gmra.mrb[0].mxu1 %v140_v55 }
 0x1d2   :  { %v343_v58 = vpop.f32.mrb[0].mxu1 }
 0x1d3   :  { %v235_v59 = vadd.f32 %v343_v58, %v142_v56  ;;  %v225_v60 = vpop.f32.mrb[1].mxu1 }
 0x1d4   :  { %v234_v61 = vadd.f32 %v225_v60, %v141_v57 }
 0x1d5   :  { %237 = vst.msk [vmem:[#allocation2 + $0x8] sm:$0xff] %vm25_vm0, %v235_v59 }
 0x1d6   :  { %236 = vst.msk [vmem:[#allocation2] sm:$0xff] %vm25_vm0, %v234_v61 }
 0x1dc   :  { %v242_v63 = vld [vmem:[#allocation2 + $0x8] sm:$0xff] }
 0x1dd   :  { %v241_v0 = vld [vmem:[#allocation2] sm:$0xff]  ;;  %v251_v1 = vadd.f32 %v273_v62, %v242_v63 }
 0x1de   :  { %v250_v2 = vadd.f32 %v273_v62, %v241_v0 }
 0x1df   :  { %253 = vst.msk [vmem:[#allocation3 + $0x8] sm:$0xff] %vm25_vm0, %v251_v1 }
 0x1e0   :  { %252 = vst.msk [vmem:[#allocation3] sm:$0xff] %vm25_vm0, %v250_v2 }
 0x1e1   :  { %403 = shalt.err (!%p400_p4)
}
 0x1e2   :  { %s404_s14 = scalar_lea.hbm %s547_s5, 256 }
 0x1e3   :  { %p405_p5 = scmp.ne.s32.totalorder %s547_s5, %s404_s14  ;;  %p408_p6 = scmp.lt.u32.totalorder %s404_s14, %s547_s5 }
 0x1e5   :  { %p410_p7 = pnand %p408_p6, %p405_p5 }
 0x1e7   :  { %413 = shalt.err (!%p410_p7)
}
 0x1e8   :  { %s418_s19 = smov 128   ;;  %s419_s20 = smov 8  }
 0x1e9   :  { %265 = dma.vmem_to_hbm [thread:$0]  %s260_s0, 256, %s547_s5, [#allocation4], %s418_s19, %s418_s19, %s419_s20  }
 0x1ea   :  { %414 = dma.done.wait [#allocation4], 256  }
 0x1eb   :  { %415 = vsyncadd [#allocation4], 4294967040 }
 0x1ec   :  { %269 = vsyncpa [#allocation4], 1 }

</bundles_post_ra>
